<compile_context>
chip_gen: v7x
topology: tpu7x:2x2x1
jax: 0.10.0
libtpu: 0.0.40
codegen_flags: <defaults>
</compile_context>

<pallas_src>
import jax
import jax.numpy as jnp
from jax.experimental import pallas as pl
from jax.experimental.pallas import tpu as pltpu

_LANE = 128  # vreg lane width; last dim of every block


def _round_up(x: int, m: int) -> int:
    return ((x + m - 1) // m) * m


def _sublane(dtype) -> int:
    # Native sublane packing per dtype width: f32 -> 8, bf16/f16 -> 16, int8/fp8 -> 32.
    return {4: 8, 2: 16, 1: 32}.get(jnp.dtype(dtype).itemsize, 8)


def _choose_tile_rows(n_rows: int, block_rows: int, sub: int) -> int:
    """Pick a sublane-aligned tile height: >=512 rows when possible, and for large
    inputs cap it so the parallel grid axis has >=2 steps (both v7x TCs work)."""
    min_rows = 512  # below this, the ~0.35us/step overhead dominates
    block_rows = _round_up(max(block_rows, min_rows), sub)
    if n_rows < 2 * min_rows:
        # Small input: a single (masked) block covers it.
        return min(block_rows, _round_up(n_rows, sub))
    half = _round_up(-(-n_rows // 2), sub)
    return max(min(block_rows, half), min_rows)


def _net_x2_kernel(params_ref, x_ref, o_ref):
    # params_ref: SMEM (3,) f32 -> [w_up, w_down, b_down]
    w_up = params_ref[0]
    w_dn = params_ref[1]
    b_dn = params_ref[2]

    # sigmoid(z) = 0.5*tanh(0.5*z) + 0.5  (exact identity), folded into the scalars:
    #   w_dn*sigmoid(w_up*x) + b_dn == c*tanh(a*x) + d
    a = 0.5 * w_up
    c = 0.5 * w_dn
    d = c + b_dn

    x = x_ref[...].astype(jnp.float32)          # upcast in-register (v5e EUP/VPU is f32-only)
    y = c * jnp.tanh(a * x) + d                 # 1 EUP transcendental + ~3 VPU ops / elem
    o_ref[...] = y.astype(o_ref.dtype)          # lane-dense unmasked store in caller dtype


def net_x2_forward(x1, w_up, w_down, b_down, *, block_rows: int = 2048):
    """x1: any-shape float tensor (PyTorch uses (..., 1)). Returns same shape & dtype."""
    orig_shape = x1.shape
    dtype = x1.dtype
    n_elems = int(x1.size)

    # Lane-dense slab (n_rows, 128) in the caller's dtype; pad only to lane granularity.
    n_rows = max(-(-n_elems // _LANE), 1)
    n_pad = n_rows * _LANE - n_elems
    flat = x1.reshape(-1)
    if n_pad:
        flat = jnp.concatenate([flat, jnp.zeros((n_pad,), dtype)])
    x2d = flat.reshape(n_rows, _LANE)

    # Scalar params live in SMEM (f32).
    params = jnp.stack(
        [w_up.reshape(()), w_down.reshape(()), b_down.reshape(())]
    ).astype(jnp.float32)

    sub = _sublane(dtype)
    tile_rows = _choose_tile_rows(n_rows, block_rows, sub)
    grid = (pl.cdiv(n_rows, tile_rows),)  # ragged last block is masked by Pallas

    itemsize = jnp.dtype(dtype).itemsize
    n_padded = n_rows * _LANE
    cost = pl.CostEstimate(
        flops=3 * n_padded,
        transcendentals=n_padded,
        bytes_accessed=2 * itemsize * n_padded + 12,
    )

    out2d = pl.pallas_call(
        _net_x2_kernel,
        out_shape=jax.ShapeDtypeStruct((n_rows, _LANE), dtype),
        grid=grid,
        in_specs=[
            pl.BlockSpec(memory_space=pltpu.MemorySpace.SMEM),      # scalar params, untiled
            pl.BlockSpec((tile_rows, _LANE), lambda i: (i, 0)),     # lane-dense row tiles
        ],
        out_specs=pl.BlockSpec((tile_rows, _LANE), lambda i: (i, 0)),
        compiler_params=pltpu.CompilerParams(
            dimension_semantics=("parallel",),   # shard row-blocks across TCs (v7x)
            vmem_limit_bytes=32 * 1024 * 1024,   # > v5e 16 MiB default, <= v6e/v7x budgets
        ),
        cost_estimate=cost,
    )(params, x2d)

    out_flat = out2d.reshape(-1)
    if n_pad:
        out_flat = out_flat[:n_elems]
    return out_flat.reshape(orig_shape)


def _reference(x1, w_up, w_down, b_down):
    xf = x1.astype(jnp.float32)
    return jax.nn.sigmoid(xf * w_up[0, 0]) * w_down[0, 0] + b_down[0]


if __name__ == "__main__":
    key = jax.random.PRNGKey(0)
    k_x, k_wu, k_wd, k_bd = jax.random.split(key, 4)

    # nn.Linear(1,1) weights / bias are scalars.
    w_up = jax.random.normal(k_wu, (1, 1), dtype=jnp.float32)
    w_down = jax.random.normal(k_wd, (1, 1), dtype=jnp.float32)
    b_down = jax.random.normal(k_bd, (1,), dtype=jnp.float32)

    TOL_F32 = 1e-4   # exact math; only transcendental-unit rounding differences remain
    TOL_BF16 = 2e-2  # final bf16 store rounding

    # --- Test 1: demo size (batch=2, seq=64, in_features=1) -> single masked tile. ---
    x1 = jax.random.normal(k_x, (2, 64, 1), dtype=jnp.float32)
    out = jax.block_until_ready(net_x2_forward(x1, w_up, w_down, b_down))
    ref = _reference(x1, w_up, w_down, b_down)
    assert out.shape == x1.shape and out.dtype == x1.dtype
    assert jnp.allclose(out, ref, atol=TOL_F32, rtol=TOL_F32)

    # --- Test 2: lane padding + ragged block path (2*4000 elems -> 63 rows). ---
    x1b = jax.random.normal(k_x, (2, 4000, 1), dtype=jnp.float32)
    outb = jax.block_until_ready(net_x2_forward(x1b, w_up, w_down, b_down))
    refb = _reference(x1b, w_up, w_down, b_down)
    assert outb.shape == x1b.shape
    assert jnp.allclose(outb, refb, atol=TOL_F32, rtol=TOL_F32)

    # --- Test 3: multi-step parallel grid (1024 rows -> 2 grid steps of 512 rows). ---
    x1c = jax.random.normal(k_x, (2, 65536, 1), dtype=jnp.float32)
    outc = jax.block_until_ready(net_x2_forward(x1c, w_up, w_down, b_down))
    refc = _reference(x1c, w_up, w_down, b_down)
    assert outc.shape == x1c.shape
    assert jnp.allclose(outc, refc, atol=TOL_F32, rtol=TOL_F32)

    # --- Test 4: dtype-preserving bf16 path (bf16 I/O, f32 compute in-register). ---
    x1d = jax.random.normal(k_x, (2, 64, 1), dtype=jnp.float32).astype(jnp.bfloat16)
    outd = jax.block_until_ready(net_x2_forward(x1d, w_up, w_down, b_down))
    refd = _reference(x1d, w_up, w_down, b_down)
    assert outd.shape == x1d.shape and outd.dtype == jnp.bfloat16
    assert jnp.allclose(outd.astype(jnp.float32), refd, atol=TOL_BF16, rtol=TOL_BF16)

    print("KERNEL_OK")
</pallas_src>

<mosaic_0001>
module attributes {stable_mosaic.version = 11 : i64} {
  func.func @_net_x2_kernel(%arg0: i32, %arg1: memref<3xf32, #tpu.memory_space<smem>>, %arg2: memref<8x128xf32, #tpu.memory_space<vmem>>, %arg3: memref<8x128xf32, #tpu.memory_space<vmem>>) attributes {dimension_semantics = [#tpu.dimension_semantics<parallel>], iteration_bounds = array<i64: 1>, scalar_prefetch = 0 : i64, scratch_operands = 0 : i64, tpu.core_type = #tpu.core_type<tc>, window_params = [{transform_indices = @transform_0, window_bounds = array<i64: 3>}, {transform_indices = @transform_1, window_bounds = array<i64: 8, 128>}, {transform_indices = @transform_2, window_bounds = array<i64: 8, 128>}]} {
    %c0 = arith.constant 0 : index
    %0 = memref.load %arg1[%c0] : memref<3xf32, #tpu.memory_space<smem>>
    %c1 = arith.constant 1 : index
    %1 = memref.load %arg1[%c1] : memref<3xf32, #tpu.memory_space<smem>>
    %c2 = arith.constant 2 : index
    %2 = memref.load %arg1[%c2] : memref<3xf32, #tpu.memory_space<smem>>
    %cst = arith.constant 5.000000e-01 : f32
    %3 = arith.mulf %cst, %0 : f32
    %cst_0 = arith.constant 5.000000e-01 : f32
    %4 = arith.mulf %cst_0, %1 : f32
    %5 = arith.addf %4, %2 : f32
    %c0_1 = arith.constant 0 : index
    %c0_2 = arith.constant 0 : index
    %6 = vector.load %arg2[%c0_1, %c0_2] : memref<8x128xf32, #tpu.memory_space<vmem>>, vector<8x128xf32>
    %7 = vector.broadcast %3 : f32 to vector<8x128xf32>
    %8 = arith.mulf %7, %6 : vector<8x128xf32>
    %9 = math.tanh %8 : vector<8x128xf32>
    %10 = vector.broadcast %4 : f32 to vector<8x128xf32>
    %11 = arith.mulf %10, %9 : vector<8x128xf32>
    %12 = vector.broadcast %5 : f32 to vector<8x128xf32>
    %13 = arith.addf %11, %12 : vector<8x128xf32>
    %c0_3 = arith.constant 0 : index
    %c0_4 = arith.constant 0 : index
    %14 = vector.load %arg3[%c0_3, %c0_4] : memref<8x128xf32, #tpu.memory_space<vmem>>, vector<8x128xf32>
    tpu.vector_store %arg3[%c0_3, %c0_4], %13 {strides = array<i32>} : memref<8x128xf32, #tpu.memory_space<vmem>>, vector<8x128xf32>,
    return
  }
  func.func @transform_0(%arg0: i32) -> i32 {
    %c0_i32 = arith.constant 0 : i32
    %c0_i32_0 = arith.constant 0 : i32
    return %c0_i32 : i32
  }
  func.func @transform_1(%arg0: i32) -> (i32, i32) {
    %c0_i32 = arith.constant 0 : i32
    %c0_i32_0 = arith.constant 0 : i32
    return %arg0, %c0_i32 : i32, i32
  }
  func.func @transform_2(%arg0: i32) -> (i32, i32) {
    %c0_i32 = arith.constant 0 : i32
    %c0_i32_0 = arith.constant 0 : i32
    return %arg0, %c0_i32 : i32, i32
  }
}

</mosaic_0001>

<bundles_post_ra>
// kernel: tpu_custom_call.1
= control target key start
LH: loop header
LB: loop body
LE: loop exit
PB: predicated region body
PF: predicated region fallthrough
CT: control target
= control target key end

     0   :  { %7 = vsyncpa [#allocation4], 0  ;;  %s145_s0 = inlined_call_operand.hbm [shape: f32[3], index: 0, kind: input, shape index: {}]   ;;  %s146_s1 = inlined_call_operand.vmem [shape: f32[1,128], index: 1, kind: input, shape index: {}]   ;;  %s147_s2 = inlined_call_operand.hbm [shape: f32[1,128], index: 2, kind: output, shape index: {}]  }
   0x1   :  { %8 = vsyncpa [#allocation3], 0  ;;  %s63_s11 = scalar_lea.hbm %s145_s0, 16 }
   0x2   :  { %p64_p0 = scmp.ne.s32.totalorder %s145_s0, %s63_s11  ;;  %p67_p1 = scmp.lt.u32.totalorder %s63_s11, %s145_s0 }
   0x4   :  { %p69_p2 = pnand %p67_p1, %p64_p0 }
   0x6   :  { %72 = shalt.err (!%p69_p2)
}
   0x7   :  { %s99_s16 = smov [#allocation2]  }
   0x8   :  { %16 = dma.hbm_to_smem %s145_s0, 16, %s99_s16, [#allocation4]  }
   0x9   :  { %95 = dma.done.wait [#allocation4], 16  }
   0xa   :  { %96 = vsyncadd [#allocation4], 4294967280 }
   0xb   :  { %22 = sfence }
   0xc   :  { %s23_s19 = sld [smem:[#allocation2]]  ;;  %s55_s20 = sld [smem:[#allocation2 + $0x1]]  ;;  %v29_v0 = vld [vmem:[%s146_s1] sm:$0xff] }
   0xd   :  { %s56_s24 = sld [smem:[#allocation2 + $0x2]] }
  0x12   :  { %s26_s21 = smul.f32 0.5, %s23_s19 }
  0x13   :  { %s27_s25 = smul.f32 0.5, %s55_s20 }
  0x14   :  { %v30_v1 = vstv %s26_s21 }
  0x15   :  { %v31_v2 = vmul.f32 %v30_v1, %v29_v0  ;;  %s28_s26 = sadd.f32 %s56_s24, %s27_s25  ;;  %v33_v3 = vstv %s27_s25 }
  0x17   :  { %61 = vtanh.f32 %v31_v2  ;;  %v35_v5 = vstv %s28_s26 }
  0x21   :  { %v62_v4 = vpop.eup %61 }
  0x22   :  { %v34_v6 = vmul.f32 %v62_v4, %v33_v3 }
  0x24   :  { %v36_v7 = vadd.f32 %v35_v5, %v34_v6 }
  0x26   :  { %37 = vst [vmem:[#allocation5] sm:$0xff] %v36_v7 }
  0x27   :  { %42 = vsyncadd [#allocation3], 112  ;;  %s100_s0 = smov [#allocation5]  }
  0x28   :  { %s43_s27 = sshll.u32 %s100_s0, 4  ;;  %s44_s27 = int_to_ptr.vmem [resolvable:$true] %s43_s27 }
  0x29   :  { %s73_s28 = scalar_lea.vmem %s44_s27, 16  ;;  %s77_s29 = scalar_lea.vmem %s44_s27, 128 }
  0x2a   :  { %p74_p3 = scmp.ne.s32.totalorder %s44_s27, %s73_s28  ;;  %p78_p4 = scmp.lt.s32.totalorder %s44_s27, %s44_s27 }
  0x2b   :  { %p79_p5 = scmp.lt.s32.totalorder %s77_s29, %s73_s28 }
  0x2d   :  { %p80_p6 = por %p79_p5, %p78_p4 }
  0x2f   :  { %p81_p7 = pnand %p80_p6, %p74_p3 }
  0x31   :  { %84 = shalt.err (!%p81_p7)
}
  0x32   :  { %s85_s3 = scalar_lea.hbm %s147_s2, 16 }
  0x33   :  { %p86_p8 = scmp.ne.s32.totalorder %s147_s2, %s85_s3  ;;  %p89_p9 = scmp.lt.u32.totalorder %s85_s3, %s147_s2 }
  0x35   :  { %p91_p10 = pnand %p89_p9, %p86_p8 }
  0x37   :  { %94 = shalt.err (!%p91_p10)
}
  0x38   :  { %s101_s8 = smov 16   ;;  %s102_s9 = smov 1  }
  0x39   :  { %49 = dma.vmem_to_hbm [thread:$0]  %s44_s27, 16, %s147_s2, [#allocation3], %s101_s8, %s101_s8, %s102_s9  }
  0x3a   :  { %97 = dma.done.wait [#allocation3], 128  }
  0x3b   :  { %98 = vsyncadd [#allocation3], 4294967168 }
  0x3c   :  { %53 = vsyncpa [#allocation3], 1 }
  0x3d   :  { %54 = vsyncpa [#allocation4], 1 }

</bundles_post_ra>
